<compile_context>
chip_gen: v7x
topology: tpu7x:2x2x1
jax: 0.10.0
libtpu: 0.0.40
codegen_flags: <defaults>
</compile_context>

<pallas_src>
import jax
import jax.numpy as jnp
from jax.experimental import pallas as pl
from jax.experimental.pallas import tpu as pltpu


def aes_head_kernel(h_ref, w_ref, b_ref, o_ref):
    """h_ref: [B, H]   bf16  last-token embeddings (whole batch, one block)
       w_ref: [H, S]   bf16  linear weight (transposed vs torch, unpadded)
       b_ref: [1, S]   f32   linear bias
       o_ref: [B, S]   f32   scores
    """
    # bf16 x bf16 on the MXU with f32 accumulation; f32 bias epilogue on the
    # VPU (right for v5e too, which has no bf16 elementwise path).
    scores = jnp.dot(h_ref[...], w_ref[...],
                     preferred_element_type=jnp.float32)      # [B, S] f32
    o_ref[...] = scores + b_ref[...]


def prepare_aes_head_params(weight, bias):
    """One-time preprocessing of the scoring-head parameters.

    weight: [H, S] float32 (transposed nn.Linear.weight)
    bias:   [S]    float32
    Returns (w_bf16 [H, S], bias_f32 [1, S]) — cache these; do NOT redo per call.
    """
    w_bf16 = weight.astype(jnp.bfloat16)
    b_f32 = bias.astype(jnp.float32).reshape(1, -1)
    return w_bf16, b_f32


def _aes_head_forward(last_hidden_state, w_bf16, b_f32):
    """Pallas scoring head: scores = last_hidden_state[:, -1, :] @ W + b.

    last_hidden_state: [B, T, H] float32/bf16 backbone output
    w_bf16:            [H, S]    bfloat16 (from prepare_aes_head_params)
    b_f32:             [1, S]    float32
    returns:           [B, S]    float32 scores
    """
    B, T, H = last_hidden_state.shape
    S = w_bf16.shape[1]

    # Last-token select done *before* pallas_call: only B*H elements cross
    # HBM->VMEM, never the full [B, T, H] tensor.  Fuses with the matmul's
    # operand prep under jit.
    last_tok = last_hidden_state[:, T - 1, :].astype(jnp.bfloat16)   # [B, H]

    # Single grid step: the whole [B, H] activation slab, the resident weight
    # and the bias each form one block (block dims == full array dims, so the
    # (8, 128) divisibility rule is satisfied without any padding).
    # VMEM check: B<=1024 @ H=4096 bf16 -> ~8 MiB activations + ~88 KB weight,
    # comfortably inside the default scoped VMEM on v5e/v6e/v7x.
    return pl.pallas_call(
        aes_head_kernel,
        out_shape=jax.ShapeDtypeStruct((B, S), jnp.float32),
        grid_spec=pltpu.PrefetchScalarGridSpec(
            num_scalar_prefetch=0,
            grid=(1,),
            in_specs=[
                pl.BlockSpec((B, H), lambda i: (0, 0)),   # activations
                pl.BlockSpec((H, S), lambda i: (0, 0)),   # weight (resident)
                pl.BlockSpec((1, S), lambda i: (0, 0)),   # bias
            ],
            out_specs=pl.BlockSpec((B, S), lambda i: (0, 0)),
        ),
        cost_estimate=pl.CostEstimate(
            flops=2 * B * H * S,
            transcendentals=0,
            bytes_accessed=H * S * 2 + B * H * 2 + B * S * 4,
        ),
        compiler_params=pltpu.CompilerParams(
            dimension_semantics=("arbitrary",)),
    )(last_tok, w_bf16, b_f32)


# Jit the whole head so slice + cast + pallas_call live in one XLA region
# (and can be inlined next to the backbone's last layer at a real call site).
aes_head_forward = jax.jit(_aes_head_forward)


if __name__ == "__main__":
    # Small shapes consistent with the module's forward:
    #   batch=2, seq=8, hidden=32, num_scores=11
    B, T, H, S = 2, 8, 32, 11

    key = jax.random.PRNGKey(0)
    k_h, k_w, k_b = jax.random.split(key, 3)

    # TODO(synk): the frozen quantized LLaMA backbone (AutoModelForCausalLM +
    # BitsAndBytes) has no Pallas equivalent here; its hidden_states[-1]
    # output is replaced by a deterministic random tensor of the same shape.
    # NOTE: [:, -1, :] takes the literal last position — matches the PyTorch
    # module only if the tokenizer uses left padding (as the original does).
    last_hidden_state = jax.random.normal(k_h, (B, T, H), dtype=jnp.float32)

    # nn.Linear(hidden_size, num_scores): torch weight [S, H], bias [S].
    # Kernel uses the transposed layout [H, S].
    w_torch = jax.random.normal(k_w, (S, H), dtype=jnp.float32) * 0.02
    bias = jax.random.normal(k_b, (S,), dtype=jnp.float32) * 0.02
    weight = w_torch.T  # [H, S]

    # One-time parameter prep (cache these in a real pipeline).
    w_bf16, b_f32 = prepare_aes_head_params(weight, bias)

    scores = aes_head_forward(last_hidden_state, w_bf16, b_f32)
    scores = jax.block_until_ready(scores)
    assert scores.shape == (B, S)

    # Reference 1: same numerics as the kernel path (bf16 matmul, f32 acc).
    h_bf = last_hidden_state[:, -1, :].astype(jnp.bfloat16)
    ref_bf = jnp.dot(h_bf, w_bf16, preferred_element_type=jnp.float32) + bias
    assert jnp.allclose(scores, ref_bf, atol=1e-5, rtol=1e-5)

    # Reference 2: full-f32 semantics of the PyTorch head (looser tolerance
    # because activations/weights are fed to the MXU in bf16).
    ref_f32 = last_hidden_state[:, -1, :] @ weight + bias
    assert jnp.allclose(scores, ref_f32, atol=2e-2, rtol=2e-2)

    print("KERNEL_OK")
</pallas_src>

<mosaic_0001>
module attributes {stable_mosaic.version = 11 : i64} {
  func.func @aes_head_kernel(%arg0: i32, %arg1: memref<2x32xbf16, #tpu.memory_space<vmem>>, %arg2: memref<32x11xbf16, #tpu.memory_space<vmem>>, %arg3: memref<1x11xf32, #tpu.memory_space<vmem>>, %arg4: memref<2x11xf32, #tpu.memory_space<vmem>>) attributes {dimension_semantics = [#tpu.dimension_semantics<arbitrary>], iteration_bounds = array<i64: 1>, scalar_prefetch = 0 : i64, scratch_operands = 0 : i64, tpu.core_type = #tpu.core_type<tc>, window_params = [{pipeline_mode = #tpu.pipeline_mode<synchronous>, transform_indices = @transform_0, window_bounds = array<i64: 2, 32>}, {pipeline_mode = #tpu.pipeline_mode<synchronous>, transform_indices = @transform_1, window_bounds = array<i64: 32, 11>}, {pipeline_mode = #tpu.pipeline_mode<synchronous>, transform_indices = @transform_2, window_bounds = array<i64: 1, 11>}, {pipeline_mode = #tpu.pipeline_mode<synchronous>, transform_indices = @transform_3, window_bounds = array<i64: 2, 11>}]} {
    %c0 = arith.constant 0 : index
    %c0_0 = arith.constant 0 : index
    %0 = vector.load %arg1[%c0, %c0_0] : memref<2x32xbf16, #tpu.memory_space<vmem>>, vector<2x32xbf16>
    %c0_1 = arith.constant 0 : index
    %c0_2 = arith.constant 0 : index
    %1 = vector.load %arg2[%c0_1, %c0_2] : memref<32x11xbf16, #tpu.memory_space<vmem>>, vector<32x11xbf16>
    %cst = arith.constant dense<0.000000e+00> : vector<2x11xf32>
    %2 = tpu.matmul %0, %1, %cst {dimension_numbers = #tpu.dot_dimension_numbers<[1], [0], [0], [1], [0, 0, 1, 1], [], []>} : vector<2x32xbf16>, vector<32x11xbf16>, vector<2x11xf32> -> vector<2x11xf32>
    %c0_3 = arith.constant 0 : index
    %c0_4 = arith.constant 0 : index
    %3 = vector.load %arg3[%c0_3, %c0_4] : memref<1x11xf32, #tpu.memory_space<vmem>>, vector<1x11xf32>
    %4 = vector.broadcast %3 : vector<1x11xf32> to vector<2x11xf32>
    %5 = arith.addf %2, %4 : vector<2x11xf32>
    %c0_5 = arith.constant 0 : index
    %c0_6 = arith.constant 0 : index
    %6 = vector.load %arg4[%c0_5, %c0_6] : memref<2x11xf32, #tpu.memory_space<vmem>>, vector<2x11xf32>
    tpu.vector_store %arg4[%c0_5, %c0_6], %5 {strides = array<i32>} : memref<2x11xf32, #tpu.memory_space<vmem>>, vector<2x11xf32>,
    return
  }
  func.func @transform_0(%arg0: i32) -> (i32, i32) {
    %c0_i32 = arith.constant 0 : i32
    %c0_i32_0 = arith.constant 0 : i32
    %c0_i32_1 = arith.constant 0 : i32
    return %c0_i32, %c0_i32_0 : i32, i32
  }
  func.func @transform_1(%arg0: i32) -> (i32, i32) {
    %c0_i32 = arith.constant 0 : i32
    %c0_i32_0 = arith.constant 0 : i32
    %c0_i32_1 = arith.constant 0 : i32
    return %c0_i32, %c0_i32_0 : i32, i32
  }
  func.func @transform_2(%arg0: i32) -> (i32, i32) {
    %c0_i32 = arith.constant 0 : i32
    %c0_i32_0 = arith.constant 0 : i32
    %c0_i32_1 = arith.constant 0 : i32
    return %c0_i32, %c0_i32_0 : i32, i32
  }
  func.func @transform_3(%arg0: i32) -> (i32, i32) {
    %c0_i32 = arith.constant 0 : i32
    %c0_i32_0 = arith.constant 0 : i32
    %c0_i32_1 = arith.constant 0 : i32
    return %c0_i32, %c0_i32_0 : i32, i32
  }
}

</mosaic_0001>

<bundles_post_ra>
// kernel: _aes_head_forward.1
= control target key start
LH: loop header
LB: loop body
LE: loop exit
PB: predicated region body
PF: predicated region fallthrough
CT: control target
= control target key end

     0   :  { %v144_v1 = vmov 0.0   ;;  %vm145_vm0 = vmmov 0   ;;  %s191_s0 = inlined_call_operand.vmem [shape: bf16[2,32], index: 0, kind: input, shape index: {}]   ;;  %s192_s1 = inlined_call_operand.vmem [shape: bf16[32,11], index: 1, kind: input, shape index: {}]   ;;  %s193_s2 = inlined_call_operand.vmem [shape: f32[1,11], index: 2, kind: input, shape index: {}]   ;;  %s194_s3 = inlined_call_operand.hbm [shape: f32[2,11], index: 3, kind: output, shape index: {}]  }
   0x1   :  { %v118_v0 = vld [vmem:[%s192_s1] sm:$0xff]   ;;  %107 = vmatprep.subr.bf16.mxu0 %v144_v1  ;;  %v119_v2 = vld [vmem:[%s192_s1 + $0x8] sm:$0xff]   ;;  %111 = vmatprep.mubr.msk.bf16.mxu0 %vm145_vm0, %v144_v1 }
   0x2   :  { %108 = vmatpush3.bf16.msra.mxu0 %v118_v0 }
   0x3   :  { %109 = vmatprep.subr.bf16.mxu0 %v144_v1 }
   0x4   :  { %8 = vsyncpa [#allocation3], 0  ;;  %v16_v3 = vld [vmem:[%s191_s0] sm:$0x1]  ;;  %vm40_vm1 = vcmask 261120   ;;  %s146_s20 = smov [#allocation2]  }
   0x5   :  { %v100_v4 = vld [vmem:[%s193_s2] ss:$0 sm:$0xff]  ;;  %s92_s21 = sshll.u32 %s146_s20, 4  ;;  %vm84_vm2 = vcmask 82944   ;;  %s93_s21 = int_to_ptr.vmem [resolvable:$true] %s92_s21 }
   0x6   :  { %110 = vmatpush3.bf16.msra.mxu0 %v119_v2  ;;  %s120_s1 = scalar_lea.vmem %s93_s21, 32  ;;  %p125_p1 = scmp.lt.s32.totalorder %s93_s21, %s93_s21 }
   0x7   :  { %p121_p0 = scmp.ne.s32.totalorder %s93_s21, %s120_s1  ;;  %p126_p2 = scmp.lt.s32.totalorder %s120_s1, %s120_s1 }
   0x9   :  { %112 = vmatmul.mubr.msk.bf16.vlgmr.msra.gmra.mrb[0].mxu0 %vm40_vm1, %v16_v3  ;;  %p127_p3 = por %p126_p2, %p125_p1 }
   0xb   :  { %p128_p4 = pnand %p127_p3, %p121_p0 }
  0xdc   :  { %v78_v5 = vpop.f32.mrb[0].mxu0 }
  0xdd   :  { %v79_v6 = vadd.f32 %v100_v4, %v78_v5  ;;  %v113_v7 = vpop.f32.mrb[1].mxu0 }
  0xde   :  { %v81_v8 = vpop.f32.mrb[2].mxu0 }
  0xdf   :  { %v114_v9 = vpop.f32.mrb[3].mxu0  ;;  %85 = vst.msk [vmem:[#allocation2] sm:$0x3] %vm84_vm2, %v79_v6 }
  0xe0   :  { %131 = shalt.err (!%p128_p4)
}
  0xe1   :  { %s132_s2 = scalar_lea.hbm %s194_s3, 32 }
  0xe2   :  { %p133_p5 = scmp.ne.s32.totalorder %s194_s3, %s132_s2  ;;  %p136_p6 = scmp.lt.u32.totalorder %s132_s2, %s194_s3 }
  0xe4   :  { %p138_p7 = pnand %p136_p6, %p133_p5 }
  0xe6   :  { %141 = shalt.err (!%p138_p7)
}
  0xe7   :  { %95 = dma.vmem_to_hbm [thread:$0]  %s93_s21, 32, %s194_s3, [#allocation3]  }
  0xe8   :  { %142 = dma.done.wait [#allocation3], 32  }
  0xe9   :  { %143 = vsyncadd [#allocation3], 4294967264 }
  0xea   :  { %99 = vsyncpa [#allocation3], 1 }

</bundles_post_ra>
